<compile_context>
chip_gen: v5e
topology: v5e:2x2
jax: 0.10.0
libtpu: 0.0.40
codegen_flags: <defaults>
</compile_context>

<pallas_src>
import jax
import jax.numpy as jnp
from jax.experimental import pallas as pl
from jax.experimental.pallas import tpu as pltpu


def _round_up(n, m):
    return ((n + m - 1) // m) * m


def _param_model_kernel(x_ref,
                        w1_ref, b1_ref,
                        w2_ref, b2_ref,
                        w3_ref, b3_ref,
                        o_ref):
    """One grid step pushes a tile of rows through the fused 3-layer MLP."""
    # Hoist bias loads once (JAX does not CSE broadcast_in_dim).
    b1 = b1_ref[...]
    b2 = b2_ref[...]
    b3 = b3_ref[...]
    cdt = w1_ref.dtype  # MXU operand dtype (f32 or bf16); accumulation is f32.

    x = x_ref[...].astype(cdt)
    h = jnp.dot(x, w1_ref[...], preferred_element_type=jnp.float32) + b1
    h = jnp.maximum(h, 0.0)
    h = jnp.dot(h.astype(cdt), w2_ref[...], preferred_element_type=jnp.float32) + b2
    h = jnp.maximum(h, 0.0)
    out = jnp.dot(h.astype(cdt), w3_ref[...], preferred_element_type=jnp.float32) + b3
    o_ref[...] = out.astype(o_ref.dtype)


def parameter_model_forward(x, params, *, tile_n=4096,
                            compute_dtype=jnp.bfloat16, min_grid_steps=8):
    """ParameterModel.forward.

    x      : (N, input_features) float32
    params : dict with W1..W3 of shape (in, out) and b1..b3 of shape (1, out)
    returns: (N, base_layer) in x.dtype
    """
    N, in_f = x.shape
    out_f = params["W3"].shape[1]

    # MXU operands in compute_dtype; biases stay f32 (added to f32 accumulator).
    w1 = params["W1"].astype(compute_dtype)
    w2 = params["W2"].astype(compute_dtype)
    w3 = params["W3"].astype(compute_dtype)
    b1 = params["b1"].astype(jnp.float32)
    b2 = params["b2"].astype(jnp.float32)
    b3 = params["b3"].astype(jnp.float32)

    # Row tile: large enough to amortize the ~600-cycle per-grid-step cost,
    # capped so the grid keeps >= min_grid_steps steps (lets the "parallel"
    # axis shard across v7x's 2 TensorCores) and never exceeds N.
    tile_n = _round_up(max(8, int(tile_n)), 8)
    cap = max(8, _round_up(pl.cdiv(N, max(1, min_grid_steps)), 8))
    tile_n = min(tile_n, cap)
    if tile_n >= N:
        tile_n = N  # single block; block == full array dim is always legal
    grid = (pl.cdiv(N, tile_n),)

    # Constant index_map -> block index never changes: Pallas keeps these
    # tensors resident in VMEM and does not re-issue their DMAs each step.
    def resident(arr):
        return pl.BlockSpec(arr.shape, lambda i: (0, 0))

    in_specs = [
        pl.BlockSpec((tile_n, in_f), lambda i: (i, 0)),   # streamed row tiles
        resident(w1), resident(b1),
        resident(w2), resident(b2),
        resident(w3), resident(b3),
    ]
    # Lane width == out_f == full last dim: no column padding, no wrapper slice.
    out_spec = pl.BlockSpec((tile_n, out_f), lambda i: (i, 0))

    fn = pl.pallas_call(
        _param_model_kernel,
        out_shape=jax.ShapeDtypeStruct((N, out_f), x.dtype),
        grid_spec=pltpu.PrefetchScalarGridSpec(
            num_scalar_prefetch=0,
            grid=grid,
            in_specs=in_specs,
            out_specs=out_spec,
        ),
        compiler_params=pltpu.CompilerParams(
            # Independent row tiles: v7x can shard the grid across its 2 TCs.
            dimension_semantics=("parallel",),
            # ~24 MiB suffices up to tile_n~8192; safe on v7x's 64 MiB/TC.
            vmem_limit_bytes=32 * 1024 * 1024,
        ),
    )
    return fn(x, w1, b1, w2, b2, w3, b3)


def init_params(key, input_features, base_layer):
    """Deterministic synthetic parameter init (shapes match the PyTorch module)."""
    dims = [(input_features, base_layer),
            (base_layer, base_layer),
            (base_layer, base_layer)]
    params = {}
    for i, (din, dout) in enumerate(dims, start=1):
        key, kw, kb = jax.random.split(key, 3)
        scale = 1.0 / jnp.sqrt(jnp.float32(din))
        params[f"W{i}"] = (jax.random.uniform(kw, (din, dout), jnp.float32,
                                              minval=-1.0, maxval=1.0) * scale)
        params[f"b{i}"] = (jax.random.uniform(kb, (1, dout), jnp.float32,
                                              minval=-1.0, maxval=1.0) * scale)
    return params


def reference_forward(x, params):
    h = jnp.maximum(x @ params["W1"] + params["b1"], 0.0)
    h = jnp.maximum(h @ params["W2"] + params["b2"], 0.0)
    return h @ params["W3"] + params["b3"]


if __name__ == "__main__":
    # Small shapes consistent with the module: batch=2, seq=8 parameter rows,
    # input_features=4, base_layer=32.
    batch, seq = 2, 8
    input_features, base_layer = 4, 32

    key = jax.random.PRNGKey(0)
    key, kx = jax.random.split(key)
    x = jax.random.normal(kx, (batch, seq, input_features), jnp.float32)
    params = init_params(key, input_features, base_layer)

    # nn.Linear applies to the last dim; flatten leading dims (N = batch * seq).
    x2d = x.reshape(batch * seq, input_features)
    ref = reference_forward(x2d, params)

    # Exact-precision path (f32 MXU operands): tight match vs reference.
    out_f32 = parameter_model_forward(x2d, params, compute_dtype=jnp.float32)
    out_f32 = jax.block_until_ready(out_f32)
    assert out_f32.shape == (batch * seq, base_layer)
    assert jnp.allclose(out_f32, ref, atol=1e-5, rtol=1e-5), "f32 mismatch vs reference"
    assert out_f32.reshape(batch, seq, base_layer).shape == (batch, seq, base_layer)

    # Default fast path (bf16 MXU operands, f32 accumulate): looser tolerance.
    out_bf16 = parameter_model_forward(x2d, params)
    out_bf16 = jax.block_until_ready(out_bf16)
    assert jnp.allclose(out_bf16, ref, atol=5e-2, rtol=5e-2), "bf16 path mismatch"

    # Uneven-N path: exercises the cdiv grid + masked partial last block
    # (no wrapper-side row padding anymore).
    N2 = 300
    key, kx2 = jax.random.split(key)
    x2 = jax.random.normal(kx2, (N2, input_features), jnp.float32)
    out2 = parameter_model_forward(x2, params, compute_dtype=jnp.float32)
    out2 = jax.block_until_ready(out2)
    ref2 = reference_forward(x2, params)
    assert out2.shape == (N2, base_layer)
    assert jnp.allclose(out2, ref2, atol=1e-5, rtol=1e-5), "uneven-N mismatch"

    print("KERNEL_OK")
</pallas_src>

<mosaic_0001>
module attributes {stable_mosaic.version = 11 : i64} {
  func.func @_param_model_kernel(%arg0: i32, %arg1: memref<8x4xf32, #tpu.memory_space<vmem>>, %arg2: memref<4x32xf32, #tpu.memory_space<vmem>>, %arg3: memref<1x32xf32, #tpu.memory_space<vmem>>, %arg4: memref<32x32xf32, #tpu.memory_space<vmem>>, %arg5: memref<1x32xf32, #tpu.memory_space<vmem>>, %arg6: memref<32x32xf32, #tpu.memory_space<vmem>>, %arg7: memref<1x32xf32, #tpu.memory_space<vmem>>, %arg8: memref<8x32xf32, #tpu.memory_space<vmem>>) attributes {dimension_semantics = [#tpu.dimension_semantics<parallel>], iteration_bounds = array<i64: 2>, scalar_prefetch = 0 : i64, scratch_operands = 0 : i64, tpu.core_type = #tpu.core_type<tc>, window_params = [{transform_indices = @transform_0, window_bounds = array<i64: 8, 4>}, {pipeline_mode = #tpu.pipeline_mode<synchronous>, transform_indices = @transform_1, window_bounds = array<i64: 4, 32>}, {pipeline_mode = #tpu.pipeline_mode<synchronous>, transform_indices = @transform_2, window_bounds = array<i64: 1, 32>}, {pipeline_mode = #tpu.pipeline_mode<synchronous>, transform_indices = @transform_3, window_bounds = array<i64: 32, 32>}, {pipeline_mode = #tpu.pipeline_mode<synchronous>, transform_indices = @transform_4, window_bounds = array<i64: 1, 32>}, {pipeline_mode = #tpu.pipeline_mode<synchronous>, transform_indices = @transform_5, window_bounds = array<i64: 32, 32>}, {pipeline_mode = #tpu.pipeline_mode<synchronous>, transform_indices = @transform_6, window_bounds = array<i64: 1, 32>}, {transform_indices = @transform_7, window_bounds = array<i64: 8, 32>}]} {
    %c0 = arith.constant 0 : index
    %c0_0 = arith.constant 0 : index
    %0 = vector.load %arg3[%c0, %c0_0] : memref<1x32xf32, #tpu.memory_space<vmem>>, vector<1x32xf32>
    %c0_1 = arith.constant 0 : index
    %c0_2 = arith.constant 0 : index
    %1 = vector.load %arg5[%c0_1, %c0_2] : memref<1x32xf32, #tpu.memory_space<vmem>>, vector<1x32xf32>
    %c0_3 = arith.constant 0 : index
    %c0_4 = arith.constant 0 : index
    %2 = vector.load %arg7[%c0_3, %c0_4] : memref<1x32xf32, #tpu.memory_space<vmem>>, vector<1x32xf32>
    %c0_5 = arith.constant 0 : index
    %c0_6 = arith.constant 0 : index
    %3 = vector.load %arg1[%c0_5, %c0_6] : memref<8x4xf32, #tpu.memory_space<vmem>>, vector<8x4xf32>
    %c0_7 = arith.constant 0 : index
    %c0_8 = arith.constant 0 : index
    %4 = vector.load %arg2[%c0_7, %c0_8] : memref<4x32xf32, #tpu.memory_space<vmem>>, vector<4x32xf32>
    %cst = arith.constant dense<0.000000e+00> : vector<8x32xf32>
    %5 = tpu.matmul %3, %4, %cst {dimension_numbers = #tpu.dot_dimension_numbers<[1], [0], [0], [1], [0, 0, 1, 1], [], []>} : vector<8x4xf32>, vector<4x32xf32>, vector<8x32xf32> -> vector<8x32xf32>
    %6 = vector.broadcast %0 : vector<1x32xf32> to vector<8x32xf32>
    %7 = arith.addf %5, %6 : vector<8x32xf32>
    %cst_9 = arith.constant 0.000000e+00 : f32
    %8 = vector.broadcast %cst_9 : f32 to vector<8x32xf32>
    %9 = arith.maximumf %7, %8 : vector<8x32xf32>
    %c0_10 = arith.constant 0 : index
    %c0_11 = arith.constant 0 : index
    %10 = vector.load %arg4[%c0_10, %c0_11] : memref<32x32xf32, #tpu.memory_space<vmem>>, vector<32x32xf32>
    %cst_12 = arith.constant dense<0.000000e+00> : vector<8x32xf32>
    %11 = tpu.matmul %9, %10, %cst_12 {dimension_numbers = #tpu.dot_dimension_numbers<[1], [0], [0], [1], [0, 0, 1, 1], [], []>} : vector<8x32xf32>, vector<32x32xf32>, vector<8x32xf32> -> vector<8x32xf32>
    %12 = vector.broadcast %1 : vector<1x32xf32> to vector<8x32xf32>
    %13 = arith.addf %11, %12 : vector<8x32xf32>
    %cst_13 = arith.constant 0.000000e+00 : f32
    %14 = vector.broadcast %cst_13 : f32 to vector<8x32xf32>
    %15 = arith.maximumf %13, %14 : vector<8x32xf32>
    %c0_14 = arith.constant 0 : index
    %c0_15 = arith.constant 0 : index
    %16 = vector.load %arg6[%c0_14, %c0_15] : memref<32x32xf32, #tpu.memory_space<vmem>>, vector<32x32xf32>
    %cst_16 = arith.constant dense<0.000000e+00> : vector<8x32xf32>
    %17 = tpu.matmul %15, %16, %cst_16 {dimension_numbers = #tpu.dot_dimension_numbers<[1], [0], [0], [1], [0, 0, 1, 1], [], []>} : vector<8x32xf32>, vector<32x32xf32>, vector<8x32xf32> -> vector<8x32xf32>
    %18 = vector.broadcast %2 : vector<1x32xf32> to vector<8x32xf32>
    %19 = arith.addf %17, %18 : vector<8x32xf32>
    %c0_17 = arith.constant 0 : index
    %c0_18 = arith.constant 0 : index
    %20 = vector.load %arg8[%c0_17, %c0_18] : memref<8x32xf32, #tpu.memory_space<vmem>>, vector<8x32xf32>
    tpu.vector_store %arg8[%c0_17, %c0_18], %19 {strides = array<i32>} : memref<8x32xf32, #tpu.memory_space<vmem>>, vector<8x32xf32>,
    return
  }
  func.func @transform_0(%arg0: i32) -> (i32, i32) {
    %c0_i32 = arith.constant 0 : i32
    %c0_i32_0 = arith.constant 0 : i32
    return %arg0, %c0_i32 : i32, i32
  }
  func.func @transform_1(%arg0: i32) -> (i32, i32) {
    %c0_i32 = arith.constant 0 : i32
    %c0_i32_0 = arith.constant 0 : i32
    %c0_i32_1 = arith.constant 0 : i32
    return %c0_i32, %c0_i32_0 : i32, i32
  }
  func.func @transform_2(%arg0: i32) -> (i32, i32) {
    %c0_i32 = arith.constant 0 : i32
    %c0_i32_0 = arith.constant 0 : i32
    %c0_i32_1 = arith.constant 0 : i32
    return %c0_i32, %c0_i32_0 : i32, i32
  }
  func.func @transform_3(%arg0: i32) -> (i32, i32) {
    %c0_i32 = arith.constant 0 : i32
    %c0_i32_0 = arith.constant 0 : i32
    %c0_i32_1 = arith.constant 0 : i32
    return %c0_i32, %c0_i32_0 : i32, i32
  }
  func.func @transform_4(%arg0: i32) -> (i32, i32) {
    %c0_i32 = arith.constant 0 : i32
    %c0_i32_0 = arith.constant 0 : i32
    %c0_i32_1 = arith.constant 0 : i32
    return %c0_i32, %c0_i32_0 : i32, i32
  }
  func.func @transform_5(%arg0: i32) -> (i32, i32) {
    %c0_i32 = arith.constant 0 : i32
    %c0_i32_0 = arith.constant 0 : i32
    %c0_i32_1 = arith.constant 0 : i32
    return %c0_i32, %c0_i32_0 : i32, i32
  }
  func.func @transform_6(%arg0: i32) -> (i32, i32) {
    %c0_i32 = arith.constant 0 : i32
    %c0_i32_0 = arith.constant 0 : i32
    %c0_i32_1 = arith.constant 0 : i32
    return %c0_i32, %c0_i32_0 : i32, i32
  }
  func.func @transform_7(%arg0: i32) -> (i32, i32) {
    %c0_i32 = arith.constant 0 : i32
    %c0_i32_0 = arith.constant 0 : i32
    return %arg0, %c0_i32 : i32, i32
  }
}

</mosaic_0001>

<bundles_post_ra>
// kernel: tpu_custom_call.1
= control target key start
LH: loop header
LB: loop body
LE: loop exit
PB: predicated region body
PF: predicated region fallthrough
CT: control target
= control target key end

     0   :  { %12 = vsyncpa [#allocation3], 0  ;;  %s889_s0 = inlined_call_operand.vmem [shape: f32[16,4], index: 0, kind: input, shape index: {}]   ;;  %s890_s1 = inlined_call_operand.vmem [shape: f32[4,32], index: 1, kind: input, shape index: {}]   ;;  %s891_s2 = inlined_call_operand.vmem [shape: f32[1,32], index: 2, kind: input, shape index: {}]   ;;  %s892_s3 = inlined_call_operand.hbm [shape: f32[32,32], index: 3, kind: input, shape index: {}]   ;;  %s893_s4 = inlined_call_operand.vmem [shape: f32[1,32], index: 4, kind: input, shape index: {}]   ;;  %s894_s5 = inlined_call_operand.hbm [shape: f32[32,32], index: 5, kind: input, shape index: {}]   ;;  %s895_s6 = inlined_call_operand.vmem [shape: f32[1,32], index: 6, kind: input, shape index: {}]   ;;  %s896_s7 = inlined_call_operand.hbm [shape: f32[16,32], index: 7, kind: output, shape index: {}]  }
   0x1   :  { %13 = vsyncpa [#allocation6], 0 }
   0x2   :  { %14 = vsyncpa [#allocation4], 0 }
   0x3   :  { %16 = vsyncpa [#allocation4 + $0x1], 0  ;;  %s764_s24 = smov 0   ;;  %s766_s25 = smov 0  }
   0x4   :  { %s768_s26 = smov 0   ;;  %s770_s27 = smov 0  }
   0x5 LB: > { %s785_s28 = sadd.s32 4294967295, %s718_s27   ;;  %s505_s29 = sadd.s32 4294967294, %s718_s27   ;;  %s718_s27 = sphi %s770_s27, %s903_s27   ;;  %s714_s26 = sphi %s768_s26, %s902_s26   ;;  %s710_s25 = sphi %s766_s25, %s901_s25   ;;  %s706_s24 = sphi %s764_s24, %s900_s24  }
   0x6   : > { %s789_s30 = sadd.s32 1, %s718_s27   ;;  %s181_s8 = sadd.s32 1, %s714_s26 }
   0x7   : > { %s178_s9 = ssub.s32 %s718_s27, %s789_s30  ;;  %p191_p0 = scmp.ne.s32.totalorder %s714_s26, %s710_s25 }
   0x8   : > { %p179_p1 = scmp.eq.s32.totalorder %s178_s9, 0  ;;  %p192_p2 = scmp.eq.s32.totalorder %s785_s28, 1 }
   0x9   : > { %p197_p3 = scmp.ne.s32.totalorder %s710_s25, %s706_s24  ;;  %p198_p4 = scmp.eq.s32.totalorder %s505_s29, 1 }
   0xa   : > { %s800_s10 = scalar_select %p179_p1, %s714_s26, %s181_s8  }
   0xb   : > { %p802_p5 = por %p192_p2, %p191_p0  ;;  %p806_p6 = por %p198_p4, %p197_p3 }
   0xc   : > { %p506_p7 = scmp.ge.s32.totalorder %s718_s27, 1  ;;  %p205_p8 = scmp.lt.s32.totalorder %s718_s27, 3 }
   0xd   : > { %p544_p9 = scmp.eq.s32.totalorder %s785_s28, 0  ;;  %s222_s16 = sshll.u32 %s892_s3, 4  ;;  %s223_s16 = int_to_ptr.hbm [resolvable:$true] %s222_s16 }
   0xe   : > { %p813_p10 = pnand %p506_p7, %p205_p8  ;;  %s720_s17 = smov [#allocation2]  }
   0xf   : > { %s224_s18 = sshll.u32 %s720_s17, 4  ;;  %s239_s21 = sshll.u32 %s894_s5, 4  ;;  %s225_s18 = int_to_ptr.vmem [resolvable:$true] %s224_s18  ;;  %s240_s21 = int_to_ptr.hbm [resolvable:$true] %s239_s21 }
  0x10   : > { %p533_p11 = pneg %p813_p10  ;;  %s721_s22 = smov 128  }
  0x11   : > { %s722_s23 = smov 8   ;;  %s723_s29 = smov [#allocation5]  }
  0x12   : > { %p534_p12 = pnand %p544_p9, %p533_p11  ;;  %s241_s8 = sshll.u32 %s723_s29, 4  ;;  %s242_s8 = int_to_ptr.vmem [resolvable:$true] %s241_s8 }
  0x13   : > { %267 = sbr.rel (%p813_p10) target bundleno = 431 (0x1af), region = 48 }
  0x14   : > { %536 = dma.hbm_to_vmem [thread:$0]  (!%p534_p12), %s223_s16, 512, %s225_s18, [#allocation3], %s721_s22, %s721_s22, %s722_s23  }
  0x15   : > { %539 = dma.hbm_to_vmem [thread:$0]  (!%p534_p12), %s240_s21, 512, %s242_s8, [#allocation6], %s721_s22, %s721_s22, %s722_s23  }
  0x18   : > { %693 = dma.done.wait (%p544_p9), [#allocation3], 512  }
  0x19   : > { %695 = vsyncadd (%p544_p9), [#allocation3], 4294966784 }
  0x1a   : > { %697 = dma.done.wait (%p544_p9), [#allocation6], 512  }
  0x1b   : > { %699 = vsyncadd (%p544_p9), [#allocation6], 4294966784  ;;  %p304_p13 = scmp.lt.s32.totalorder %s785_s28, 1  ;;  %vm320_vm0 = vcmask 1043456   ;;  %vm316_vm1 = vcmask 31744   ;;  %v348_v2 = vld [vmem:[#allocation2 + $0x18] sm:$0xff] }
  0x1c   : > { %v312_v0 = vld [vmem:[%s890_s1] sm:$0xf]  ;;  %368 = vmatpush.msra.mxu1 %v348_v2  ;;  %v347_v3 = vld [vmem:[#allocation2 + $0x10] sm:$0xff]  ;;  %v346_v4 = vld [vmem:[#allocation2 + $0x8] sm:$0xff]  ;;  %vm352_vm2 = vcmask 261120   ;;  %s301_s23 = sand.u32 1, %s710_s25  }
  0x1d   : > { %s305_s9 = scalar_select %p304_p13, %s785_s28, 1  ;;  %515 = vmatpush.msk.msra.mxu0 %vm320_vm0, %v312_v0  ;;  %v345_v5 = vld [vmem:[#allocation2] sm:$0xff]  ;;  %v380_v6 = vld [vmem:[#allocation5 + $0x18] sm:$0xff]  ;;  %v379_v11 = vld [vmem:[#allocation5 + $0x10] sm:$0xff] }
  0x1e   : > { %369 = vmatpush.msra.mxu1 %v347_v3  ;;  %399 = vmatpush.msra.mxu2 %v380_v6  ;;  %v585_v7 = vld [vmem:[%s891_s2] ss:$0 sm:$0xff]  ;;  %v378_v12 = vld [vmem:[#allocation5 + $0x8] sm:$0xff]  ;;  %s513_s29 = sshll.u32 %s301_s23, 3  ;;  %s520_s8 = sshll.u32 %s785_s28, 3 }
  0x1f   : > { %s514_s14 = sshll.u32 %s305_s9, 3  ;;  %v377_v13 = vld [vmem:[#allocation5] sm:$0xff]  ;;  %s419_s13 = scalar_lea.hbm %s896_s7, %s520_s8 }
  0x20   : > { %s307_s16 = scalar_lea.vmem %s889_s0, %s514_s14  ;;  %370 = vmatpush.msra.mxu1 %v346_v4  ;;  %400 = vmatpush.msra.mxu2 %v379_v11  ;;  %v586_v14 = vld [vmem:[%s893_s4] ss:$0 sm:$0xff]  ;;  %s303_s17 = scalar_lea.vmem [#allocation7], %s513_s29 }
  0x21   : > { %v311_v1 = vld [vmem:[%s307_s16] sm:$0xff]  ;;  %s421_s18 = sshll.u32 %s303_s17, 4  ;;  %s423_s19 = sshll.u32 %s419_s13, 4  ;;  %s422_s18 = int_to_ptr.vmem [resolvable:$true] %s421_s18  ;;  %s424_s19 = int_to_ptr.hbm [resolvable:$true] %s423_s19 }
  0x22   : > { %516 = vmatmul.msk.f32.vlgmr.msra.gmra.mxu0 %vm316_vm1, %v311_v1  ;;  %371 = vmatpush.msra.mxu1 %v345_v5  ;;  %v587_v18 = vld [vmem:[%s895_s6] ss:$0 sm:$0xff]  ;;  %s409_s20 = scalar_lea.sflag [#allocation4], %s301_s23  ;;  %s662_s28 = sshra.s32 %s424_s19, 4  ;;  %s663_s28 = int_to_ptr.hbm [resolvable:$true] %s662_s28 }
  0x23   : > { %401 = vmatpush.msra.mxu2 %v378_v12  ;;  %s664_s21 = scalar_lea.hbm %s663_s28, 8  ;;  %s668_s29 = scalar_lea.hbm %s896_s7, 16 }
  0x24   : > { %p665_p0 = scmp.ne.s32.totalorder %s663_s28, %s664_s21  ;;  %p669_p3 = scmp.lt.s32.totalorder %s663_s28, %s896_s7 }
  0x25   : > { %402 = vmatpush.msra.mxu2 %v377_v13  ;;  %p670_p4 = scmp.lt.s32.totalorder %s668_s29, %s664_s21 }
  0x26   : > { %p666_p1 = pnand %p665_p0, %p802_p5 }
  0x27   : > { %p671_p7 = por %p670_p4, %p669_p3 }
  0x28   : > { %p667_p2 = pneg %p666_p1 }
  0x2a   : > { %p672_p8 = pnand %p671_p7, %p667_p2 }
  0x9f   : > { %v341_v8 = vpop.f32.mrf.mxu0 }
  0xa0   : > { %v342_v9 = vadd.f32 %v585_v7, %v341_v8 }
  0xa2   : > { %v344_v10 = vmax.f32 %v342_v9, 0.0 }
  0xa4   : > { %517 = vmatmul.msk.f32.vlgmr.msra.gmra.mxu1 %vm352_vm2, %v344_v10 }
 0x121   : > { %v373_v15 = vpop.f32.mrf.mxu1 }
 0x122   : > { %v374_v16 = vadd.f32 %v586_v14, %v373_v15 }
 0x124   : > { %v376_v17 = vmax.f32 %v374_v16, 0.0 }
 0x126   : > { %518 = vmatmul.msk.f32.vlgmr.msra.gmra.mxu2 %vm352_vm2, %v376_v17 }
 0x1a9   : > { %v404_v19 = vpop.f32.mrf.mxu2 }
 0x1aa   : > { %v405_v20 = vadd.f32 %v587_v18, %v404_v19 }
 0x1ac   : > { %407 = vst.msk [vmem:[%s303_s17] sm:$0xff] %vm352_vm2, %v405_v20 }
 0x1ad   : > { %675 = shalt.err (!%p672_p8)
}
 0x1ae   : > { %531 = dma.vmem_to_hbm [thread:$0]  (%p802_p5), %s422_s18, 128, %s424_s19, %s409_s20  }
 0x1af PF: > { %p548_p9 = scmp.ge.s32.totalorder %s718_s27, 2  ;;  %s435_s23 = sand.u32 1, %s706_s24  }
 0x1b0   : > { %s436_s13 = scalar_lea.sflag [#allocation4], %s435_s23 }
 0x1b1   : > { %p541_p10 = pnand %p548_p9, %p806_p6 }
 0x1b3   : > { %p542_p11 = pneg %p541_p10 }
 0x1b5   : > { %701 = dma.done.wait (%p542_p11), %s436_s13, 128  }
 0x1b6   : > { %703 = vsyncadd (%p542_p11), %s436_s13, 4294967168  ;;  %p19_p12 = scmp.ge.s32.totalorder %s789_s30, 4   ;;  %s900_s24 = smov %s710_s25 }
 0x1b7   : > { %s901_s25 = smov %s714_s26  ;;  %s902_s26 = smov %s800_s10 }
 0x1b8   : > { %s903_s27 = smov %s789_s30  ;;  %21 = sbr.rel (!%p19_p12) target bundleno = 5 (0x5), region = 92 }
 0x1bd   :  { %442 = vsyncpa [#allocation3], 1 }
 0x1be   :  { %444 = vsyncpa [#allocation3 + $0x1], 1 }
 0x1bf   :  { %445 = vsyncpa [#allocation6], 1 }
 0x1c0   :  { %446 = vsyncpa [#allocation4], 1 }
 0x1c1   :  { %448 = vsyncpa [#allocation4 + $0x1], 1 }

</bundles_post_ra>
